<compile_context>
chip_gen: v7x
topology: tpu7x:2x2x1
jax: 0.10.0
libtpu: 0.0.40
codegen_flags: <defaults>
</compile_context>

<pallas_src>
import functools

import jax
import jax.numpy as jnp
from jax.experimental import pallas as pl
from jax.experimental.pallas import tpu as pltpu


_SQRT_2_OVER_PI = 0.7978845608028654


def _gelu_tanh(v):
    return 0.5 * v * (1.0 + jnp.tanh(_SQRT_2_OVER_PI * (v + 0.044715 * v * v * v)))


def _round_up(n, m):
    return ((n + m - 1) // m) * m


def _pick_batch_tile(B, Cp):
    """Batch elements folded into one grid step.

    Target Bt*Cp ~ 256 rows so the channel-mixer matmul has a respectable M dim,
    but keep >= 2 grid steps (both v7x TensorCores busy) only when that still
    leaves Bt*Cp >= 128.  At tiny B (demo) the whole batch is folded into one
    step: on v5e/v6e (1 TC) one step beats two serial steps, and the kernel is
    launch/latency bound anyway.
    """
    max_bt = max(1, 256 // Cp)
    bt = min(B, max_bt)
    while B % bt:
        bt -= 1
    if B // bt == 1 and B % 2 == 0 and (B // 2) * Cp >= 128:
        bt = B // 2
    return bt


# -----------------------------------------------------------------------------
# Pallas kernel: full MLP_Communicator forward for a block of Bt batch elements
# -----------------------------------------------------------------------------
def _mixer_kernel(x_ref, w1t_ref, b1t_ref, w2t_ref, b2t_ref,
                  w1c_ref, b1c_ref, w2c_ref, b2c_ref, o_ref, *, depth):
    """Refs (Cp = channel padded to 8 sublanes, Tp = token padded to 128 lanes, H hidden):
       x_ref   : [Bt, Cp, Tp] f32   activations, channel-major (like the module)
       w1t_ref : [H,  Cp]     bf16  token-mixer Linear1 weight  (zero-padded cols)
       b1t_ref : [H,  1 ]     f32
       w2t_ref : [Cp, H ]     bf16  token-mixer Linear2 weight  (zero-padded rows)
       b2t_ref : [Cp, 1 ]     f32                               (zero-padded)
       w1c_ref : [Tp, H ]     bf16  channel-mixer Linear1 weight^T (zero-padded rows)
       b1c_ref : [1,  H ]     f32
       w2c_ref : [H,  Tp]     bf16  channel-mixer Linear2 weight^T (zero-padded cols)
       b2c_ref : [1,  Tp]     f32                                  (zero-padded)
       o_ref   : [Bt, Cp, Tp] f32
    """
    Bt, Cp, Tp = x_ref.shape
    H = w1t_ref.shape[0]
    f32, bf16 = jnp.float32, jnp.bfloat16

    x = x_ref[...]                       # carried residual stays f32 across depth

    # Weights loaded once (bf16 MXU operands, f32 accumulation).  The [Bt, ...]
    # replication feeds the batched token-mixer dots; hoisted out of the loop.
    w1t = jnp.broadcast_to(w1t_ref[...][None], (Bt, H, Cp))      # [Bt, H, Cp] bf16
    w2t = jnp.broadcast_to(w2t_ref[...][None], (Bt, Cp, H))      # [Bt, Cp, H] bf16
    w1c = w1c_ref[...]                                           # [Tp, H]     bf16
    w2c = w2c_ref[...]                                           # [H, Tp]     bf16

    # Bias lane/sublane broadcasts hoisted out of the depth loop (JAX does not CSE
    # broadcast_in_dim).  Kept f32: all elementwise math stays f32 (v5e-safe).
    b1t = jnp.broadcast_to(b1t_ref[...].reshape(1, H, 1), (Bt, H, Tp))
    b2t = jnp.broadcast_to(b2t_ref[...].reshape(1, Cp, 1), (Bt, Cp, Tp))
    b1c = jnp.broadcast_to(b1c_ref[...], (Bt * Cp, H))
    b2c = jnp.broadcast_to(b2c_ref[...], (Bt * Cp, Tp))

    def one_depth(x):
        # ---- token mixer: mixes the channel axis -----------------------------
        # (Rearrange -> Linear/GELU/Linear -> Rearrange in PyTorch).  Batched
        # dot_general over Bt -> pre-transposed weights, zero in-kernel transposes.
        xb = x.astype(bf16)
        h = jnp.einsum('bhc,bct->bht', w1t, xb,
                       preferred_element_type=f32)                # [Bt, H, Tp]
        h = _gelu_tanh(h + b1t)
        d = jnp.einsum('bch,bht->bct', w2t, h.astype(bf16),
                       preferred_element_type=f32)                # [Bt, Cp, Tp]
        x = x + d + b2t

        # ---- channel mixer: mixes the token axis ------------------------------
        # Batch folded into the matmul M dim: (Bt, Cp, Tp) -> (Bt*Cp, Tp) is a free
        # view because Cp % 8 == 0 and Tp % 128 == 0.
        x2 = x.reshape(Bt * Cp, Tp)
        hc = jnp.dot(x2.astype(bf16), w1c, preferred_element_type=f32)   # [Bt*Cp, H]
        hc = _gelu_tanh(hc + b1c)
        dc = jnp.dot(hc.astype(bf16), w2c, preferred_element_type=f32)   # [Bt*Cp, Tp]
        return (x2 + dc + b2c).reshape(Bt, Cp, Tp)

    if depth <= 4:
        # Small depth: fully unrolled, x lives in vregs/VMEM the whole time.
        for _ in range(depth):
            x = one_depth(x)
    else:
        # Large depth: fori_loop bounds live ranges (avoids vreg-spill / code-size
        # blowup of a fully-unrolled Python loop).
        x = jax.lax.fori_loop(0, depth, lambda _, v: one_depth(v), x)

    o_ref[...] = x


# -----------------------------------------------------------------------------
# Wrapper: padding, weight pre-transposition + bf16 cast, pallas_call
# -----------------------------------------------------------------------------
def mlp_communicator(x, params, *, depth, unpad=True):
    """x: [B, C, T] (batch, channel, token) -> [B, C, T]; eval-mode forward.

    unpad=False returns the padded [B, Cp, Tp] buffer directly (skips the extra
    HBM copy of the slice) for consumers that can index the real C x T region.
    """
    B, C, T = x.shape
    w1t, b1t, w2t, b2t = params["token"]      # [H,C], [H], [C,H], [C]
    w1c, b1c, w2c, b2c = params["channel"]    # [H,T], [H], [T,H], [T]
    H = w1t.shape[0]

    Cp = _round_up(C, 8)          # sublane-align the channel axis
    Tp = _round_up(T, 128)        # lane-align the token axis (lane-dense stores)
    Bt = _pick_batch_tile(B, Cp)  # batch elements folded into one grid step
    grid = (B // Bt,)

    f32, bf16 = jnp.float32, jnp.bfloat16
    # Padding invariant (IMPORTANT): the padded rows/lanes of x accumulate garbage
    # (gelu(bias) terms) after the first depth iteration, but they can never leak
    # into the real C x T region because the matching weight paddings (w1t cols >= C,
    # w2t rows >= C, w1c rows >= T, w2c cols >= T and padded bias entries) are exactly
    # zero.  Never let a consumer read the padded region of an unpad=False output.
    xp    = jnp.pad(x.astype(f32), ((0, 0), (0, Cp - C), (0, Tp - T)))
    w1t_p = jnp.pad(w1t.astype(f32), ((0, 0), (0, Cp - C))).astype(bf16)    # [H, Cp]
    b1t_p = b1t.astype(f32).reshape(H, 1)                                   # [H, 1]
    w2t_p = jnp.pad(w2t.astype(f32), ((0, Cp - C), (0, 0))).astype(bf16)    # [Cp, H]
    b2t_p = jnp.pad(b2t.astype(f32), (0, Cp - C)).reshape(Cp, 1)            # [Cp, 1]
    w1c_p = jnp.pad(w1c.T.astype(f32), ((0, Tp - T), (0, 0))).astype(bf16)  # [Tp, H]
    b1c_p = b1c.astype(f32).reshape(1, H)                                   # [1, H]
    w2c_p = jnp.pad(w2c.T.astype(f32), ((0, 0), (0, Tp - T))).astype(bf16)  # [H, Tp]
    b2c_p = jnp.pad(b2c.astype(f32), (0, Tp - T)).reshape(1, Tp)            # [1, Tp]

    def invariant_spec(arr):
        zeros = (0,) * arr.ndim
        # TODO(synk): at production C/T/H, mark these grid-invariant weight specs with
        # pipeline_mode=pl.Buffered(1) and set vmem_limit_bytes explicitly (v7x has only
        # 64 MiB physical VMEM); irrelevant at these shapes.
        return pl.BlockSpec(arr.shape, lambda g: zeros)

    kernel = functools.partial(_mixer_kernel, depth=depth)
    out = pl.pallas_call(
        kernel,
        out_shape=jax.ShapeDtypeStruct((B, Cp, Tp), f32),
        grid=grid,
        in_specs=[pl.BlockSpec((Bt, Cp, Tp), lambda g: (g, 0, 0)),
                  invariant_spec(w1t_p), invariant_spec(b1t_p),
                  invariant_spec(w2t_p), invariant_spec(b2t_p),
                  invariant_spec(w1c_p), invariant_spec(b1c_p),
                  invariant_spec(w2c_p), invariant_spec(b2c_p)],
        out_specs=pl.BlockSpec((Bt, Cp, Tp), lambda g: (g, 0, 0)),
        compiler_params=pltpu.CompilerParams(
            dimension_semantics=("parallel",)),
    )(xp, w1t_p, b1t_p, w2t_p, b2t_p, w1c_p, b1c_p, w2c_p, b2c_p)

    if unpad:
        return out[:, :C, :T]
    return out


# -----------------------------------------------------------------------------
# Pure-JAX reference (mirrors the PyTorch forward; Dropout = identity in eval)
# -----------------------------------------------------------------------------
def _mlp_block_ref(v, w1, b1, w2, b2):
    h = _gelu_tanh(v @ w1.T + b1)
    return h @ w2.T + b2


def mlp_communicator_ref(x, params, *, depth):
    w1t, b1t, w2t, b2t = params["token"]
    w1c, b1c, w2c, b2c = params["channel"]
    x = x.astype(jnp.float32)
    for _ in range(depth):
        xt = jnp.swapaxes(x, 1, 2)                                        # b n d -> b d n
        x = x + jnp.swapaxes(_mlp_block_ref(xt, w1t, b1t, w2t, b2t), 1, 2)
        x = x + _mlp_block_ref(x, w1c, b1c, w2c, b2c)
    return x


# -----------------------------------------------------------------------------
# Deterministic parameter init (matches nn.Linear shapes: uniform(-1/sqrt(in), +))
# -----------------------------------------------------------------------------
def init_params(key, channel, token, hidden):
    def linear(k, in_dim, out_dim):
        kw, kb = jax.random.split(k)
        bound = 1.0 / float(jnp.sqrt(jnp.float32(in_dim)))
        w = jax.random.uniform(kw, (out_dim, in_dim), jnp.float32, -bound, bound)
        b = jax.random.uniform(kb, (out_dim,), jnp.float32, -bound, bound)
        return w, b

    k1, k2, k3, k4 = jax.random.split(key, 4)
    w1t, b1t = linear(k1, channel, hidden)   # token mixer:   Linear(channel, hidden)
    w2t, b2t = linear(k2, hidden, channel)   #                Linear(hidden, channel)
    w1c, b1c = linear(k3, token, hidden)     # channel mixer: Linear(token, hidden)
    w2c, b2c = linear(k4, hidden, token)     #                Linear(hidden, token)
    return {"token": (w1t, b1t, w2t, b2t), "channel": (w1c, b1c, w2c, b2c)}


if __name__ == "__main__":
    # Small shapes consistent with the module's forward:
    #   x [batch=2, channel=4, token=16], hidden_size=32, depth=2
    B, C, T, H, depth = 2, 4, 16, 32, 2

    root = jax.random.PRNGKey(0)
    kx, kp = jax.random.split(root)
    x = jax.random.normal(kx, (B, C, T), jnp.float32)
    params = init_params(kp, C, T, H)

    out = mlp_communicator(x, params, depth=depth)
    out = jax.block_until_ready(out)
    assert out.shape == (B, C, T), out.shape

    ref = mlp_communicator_ref(x, params, depth=depth)
    max_diff = float(jnp.max(jnp.abs(out - ref)))
    # bf16 MXU operands (f32 accumulation) -> ~1e-2-level tolerance vs f32 reference.
    assert max_diff < 5e-2, f"mismatch vs reference: {max_diff}"

    print("KERNEL_OK")
</pallas_src>

<mosaic_0001>
module attributes {stable_mosaic.version = 11 : i64} {
  func.func @_mixer_kernel(%arg0: i32, %arg1: memref<2x8x128xf32, #tpu.memory_space<vmem>>, %arg2: memref<32x8xbf16, #tpu.memory_space<vmem>>, %arg3: memref<32x1xf32, #tpu.memory_space<vmem>>, %arg4: memref<8x32xbf16, #tpu.memory_space<vmem>>, %arg5: memref<8x1xf32, #tpu.memory_space<vmem>>, %arg6: memref<128x32xbf16, #tpu.memory_space<vmem>>, %arg7: memref<1x32xf32, #tpu.memory_space<vmem>>, %arg8: memref<32x128xbf16, #tpu.memory_space<vmem>>, %arg9: memref<1x128xf32, #tpu.memory_space<vmem>>, %arg10: memref<2x8x128xf32, #tpu.memory_space<vmem>>) attributes {dimension_semantics = [#tpu.dimension_semantics<parallel>], iteration_bounds = array<i64: 1>, scalar_prefetch = 0 : i64, scratch_operands = 0 : i64, tpu.core_type = #tpu.core_type<tc>, window_params = [{transform_indices = @transform_0, window_bounds = array<i64: 2, 8, 128>}, {pipeline_mode = #tpu.pipeline_mode<synchronous>, transform_indices = @transform_1, window_bounds = array<i64: 32, 8>}, {pipeline_mode = #tpu.pipeline_mode<synchronous>, transform_indices = @transform_2, window_bounds = array<i64: 32, 1>}, {pipeline_mode = #tpu.pipeline_mode<synchronous>, transform_indices = @transform_3, window_bounds = array<i64: 8, 32>}, {pipeline_mode = #tpu.pipeline_mode<synchronous>, transform_indices = @transform_4, window_bounds = array<i64: 8, 1>}, {pipeline_mode = #tpu.pipeline_mode<synchronous>, transform_indices = @transform_5, window_bounds = array<i64: 128, 32>}, {pipeline_mode = #tpu.pipeline_mode<synchronous>, transform_indices = @transform_6, window_bounds = array<i64: 1, 32>}, {pipeline_mode = #tpu.pipeline_mode<synchronous>, transform_indices = @transform_7, window_bounds = array<i64: 32, 128>}, {pipeline_mode = #tpu.pipeline_mode<synchronous>, transform_indices = @transform_8, window_bounds = array<i64: 1, 128>}, {transform_indices = @transform_9, window_bounds = array<i64: 2, 8, 128>}]} {
    %c0 = arith.constant 0 : index
    %c0_0 = arith.constant 0 : index
    %c0_1 = arith.constant 0 : index
    %0 = vector.load %arg1[%c0, %c0_0, %c0_1] : memref<2x8x128xf32, #tpu.memory_space<vmem>>, vector<2x8x128xf32>
    %c0_2 = arith.constant 0 : index
    %c0_3 = arith.constant 0 : index
    %1 = vector.load %arg2[%c0_2, %c0_3] : memref<32x8xbf16, #tpu.memory_space<vmem>>, vector<32x8xbf16>
    %2 = vector.shape_cast %1 : vector<32x8xbf16> to vector<1x32x8xbf16>
    %3 = vector.shape_cast %2 : vector<1x32x8xbf16> to vector<1x32x8xbf16>
    %4 = vector.broadcast %3 : vector<1x32x8xbf16> to vector<2x32x8xbf16>
    %c0_4 = arith.constant 0 : index
    %c0_5 = arith.constant 0 : index
    %5 = vector.load %arg4[%c0_4, %c0_5] : memref<8x32xbf16, #tpu.memory_space<vmem>>, vector<8x32xbf16>
    %6 = vector.shape_cast %5 : vector<8x32xbf16> to vector<1x8x32xbf16>
    %7 = vector.shape_cast %6 : vector<1x8x32xbf16> to vector<1x8x32xbf16>
    %8 = vector.broadcast %7 : vector<1x8x32xbf16> to vector<2x8x32xbf16>
    %c0_6 = arith.constant 0 : index
    %c0_7 = arith.constant 0 : index
    %9 = vector.load %arg6[%c0_6, %c0_7] : memref<128x32xbf16, #tpu.memory_space<vmem>>, vector<128x32xbf16>
    %c0_8 = arith.constant 0 : index
    %c0_9 = arith.constant 0 : index
    %10 = vector.load %arg8[%c0_8, %c0_9] : memref<32x128xbf16, #tpu.memory_space<vmem>>, vector<32x128xbf16>
    %c0_10 = arith.constant 0 : index
    %c0_11 = arith.constant 0 : index
    %11 = vector.load %arg3[%c0_10, %c0_11] : memref<32x1xf32, #tpu.memory_space<vmem>>, vector<32x1xf32>
    %12 = vector.shape_cast %11 : vector<32x1xf32> to vector<1x32x1xf32>
    %13 = vector.shape_cast %12 : vector<1x32x1xf32> to vector<1x32x1xf32>
    %14 = vector.broadcast %13 : vector<1x32x1xf32> to vector<2x32x128xf32>
    %c0_12 = arith.constant 0 : index
    %c0_13 = arith.constant 0 : index
    %15 = vector.load %arg5[%c0_12, %c0_13] : memref<8x1xf32, #tpu.memory_space<vmem>>, vector<8x1xf32>
    %16 = vector.shape_cast %15 : vector<8x1xf32> to vector<1x8x1xf32>
    %17 = vector.shape_cast %16 : vector<1x8x1xf32> to vector<1x8x1xf32>
    %18 = vector.broadcast %17 : vector<1x8x1xf32> to vector<2x8x128xf32>
    %c0_14 = arith.constant 0 : index
    %c0_15 = arith.constant 0 : index
    %19 = vector.load %arg7[%c0_14, %c0_15] : memref<1x32xf32, #tpu.memory_space<vmem>>, vector<1x32xf32>
    %20 = vector.shape_cast %19 : vector<1x32xf32> to vector<1x32xf32>
    %21 = vector.broadcast %20 : vector<1x32xf32> to vector<16x32xf32>
    %c0_16 = arith.constant 0 : index
    %c0_17 = arith.constant 0 : index
    %22 = vector.load %arg9[%c0_16, %c0_17] : memref<1x128xf32, #tpu.memory_space<vmem>>, vector<1x128xf32>
    %23 = vector.shape_cast %22 : vector<1x128xf32> to vector<1x128xf32>
    %24 = vector.broadcast %23 : vector<1x128xf32> to vector<16x128xf32>
    %25 = arith.truncf %0 : vector<2x8x128xf32> to vector<2x8x128xbf16>
    "tpu.trace_start"() <{level = 10 : i32, message = "bhc,bct->bht"}> : () -> ()
    %cst = arith.constant dense<0.000000e+00> : vector<2x32x128xf32>
    %26 = tpu.matmul %4, %25, %cst {dimension_numbers = #tpu.dot_dimension_numbers<[2], [1], [1], [2], [0, 0, 0, 1, 1, 2], [0], [0]>} : vector<2x32x8xbf16>, vector<2x8x128xbf16>, vector<2x32x128xf32> -> vector<2x32x128xf32>
    "tpu.trace_stop"() : () -> ()
    %27 = arith.addf %26, %14 : vector<2x32x128xf32>
    %cst_18 = arith.constant 5.000000e-01 : f32
    %28 = vector.broadcast %cst_18 : f32 to vector<2x32x128xf32>
    %29 = arith.mulf %28, %27 : vector<2x32x128xf32>
    %cst_19 = arith.constant 4.471500e-02 : f32
    %30 = vector.broadcast %cst_19 : f32 to vector<2x32x128xf32>
    %31 = arith.mulf %30, %27 : vector<2x32x128xf32>
    %32 = arith.mulf %31, %27 : vector<2x32x128xf32>
    %33 = arith.mulf %32, %27 : vector<2x32x128xf32>
    %34 = arith.addf %27, %33 : vector<2x32x128xf32>
    %cst_20 = arith.constant 0.797884583 : f32
    %35 = vector.broadcast %cst_20 : f32 to vector<2x32x128xf32>
    %36 = arith.mulf %35, %34 : vector<2x32x128xf32>
    %37 = math.tanh %36 : vector<2x32x128xf32>
    %cst_21 = arith.constant 1.000000e+00 : f32
    %38 = vector.broadcast %cst_21 : f32 to vector<2x32x128xf32>
    %39 = arith.addf %38, %37 : vector<2x32x128xf32>
    %40 = arith.mulf %29, %39 : vector<2x32x128xf32>
    %41 = arith.truncf %40 : vector<2x32x128xf32> to vector<2x32x128xbf16>
    "tpu.trace_start"() <{level = 10 : i32, message = "bch,bht->bct"}> : () -> ()
    %cst_22 = arith.constant dense<0.000000e+00> : vector<2x8x128xf32>
    %42 = tpu.matmul %8, %41, %cst_22 {dimension_numbers = #tpu.dot_dimension_numbers<[2], [1], [1], [2], [0, 0, 0, 1, 1, 2], [0], [0]>} : vector<2x8x32xbf16>, vector<2x32x128xbf16>, vector<2x8x128xf32> -> vector<2x8x128xf32>
    "tpu.trace_stop"() : () -> ()
    %43 = arith.addf %0, %42 : vector<2x8x128xf32>
    %44 = arith.addf %43, %18 : vector<2x8x128xf32>
    %45 = vector.shape_cast %44 : vector<2x8x128xf32> to vector<16x128xf32>
    %46 = arith.truncf %45 : vector<16x128xf32> to vector<16x128xbf16>
    %cst_23 = arith.constant dense<0.000000e+00> : vector<16x32xf32>
    %47 = tpu.matmul %46, %9, %cst_23 {dimension_numbers = #tpu.dot_dimension_numbers<[1], [0], [0], [1], [0, 0, 1, 1], [], []>} : vector<16x128xbf16>, vector<128x32xbf16>, vector<16x32xf32> -> vector<16x32xf32>
    %48 = arith.addf %47, %21 : vector<16x32xf32>
    %cst_24 = arith.constant 5.000000e-01 : f32
    %49 = vector.broadcast %cst_24 : f32 to vector<16x32xf32>
    %50 = arith.mulf %49, %48 : vector<16x32xf32>
    %cst_25 = arith.constant 4.471500e-02 : f32
    %51 = vector.broadcast %cst_25 : f32 to vector<16x32xf32>
    %52 = arith.mulf %51, %48 : vector<16x32xf32>
    %53 = arith.mulf %52, %48 : vector<16x32xf32>
    %54 = arith.mulf %53, %48 : vector<16x32xf32>
    %55 = arith.addf %48, %54 : vector<16x32xf32>
    %cst_26 = arith.constant 0.797884583 : f32
    %56 = vector.broadcast %cst_26 : f32 to vector<16x32xf32>
    %57 = arith.mulf %56, %55 : vector<16x32xf32>
    %58 = math.tanh %57 : vector<16x32xf32>
    %cst_27 = arith.constant 1.000000e+00 : f32
    %59 = vector.broadcast %cst_27 : f32 to vector<16x32xf32>
    %60 = arith.addf %59, %58 : vector<16x32xf32>
    %61 = arith.mulf %50, %60 : vector<16x32xf32>
    %62 = arith.truncf %61 : vector<16x32xf32> to vector<16x32xbf16>
    %cst_28 = arith.constant dense<0.000000e+00> : vector<16x128xf32>
    %63 = tpu.matmul %62, %10, %cst_28 {dimension_numbers = #tpu.dot_dimension_numbers<[1], [0], [0], [1], [0, 0, 1, 1], [], []>} : vector<16x32xbf16>, vector<32x128xbf16>, vector<16x128xf32> -> vector<16x128xf32>
    %64 = arith.addf %45, %63 : vector<16x128xf32>
    %65 = arith.addf %64, %24 : vector<16x128xf32>
    %66 = vector.shape_cast %65 : vector<16x128xf32> to vector<2x8x128xf32>
    %67 = arith.truncf %66 : vector<2x8x128xf32> to vector<2x8x128xbf16>
    "tpu.trace_start"() <{level = 10 : i32, message = "bhc,bct->bht"}> : () -> ()
    %cst_29 = arith.constant dense<0.000000e+00> : vector<2x32x128xf32>
    %68 = tpu.matmul %4, %67, %cst_29 {dimension_numbers = #tpu.dot_dimension_numbers<[2], [1], [1], [2], [0, 0, 0, 1, 1, 2], [0], [0]>} : vector<2x32x8xbf16>, vector<2x8x128xbf16>, vector<2x32x128xf32> -> vector<2x32x128xf32>
    "tpu.trace_stop"() : () -> ()
    %69 = arith.addf %68, %14 : vector<2x32x128xf32>
    %cst_30 = arith.constant 5.000000e-01 : f32
    %70 = vector.broadcast %cst_30 : f32 to vector<2x32x128xf32>
    %71 = arith.mulf %70, %69 : vector<2x32x128xf32>
    %cst_31 = arith.constant 4.471500e-02 : f32
    %72 = vector.broadcast %cst_31 : f32 to vector<2x32x128xf32>
    %73 = arith.mulf %72, %69 : vector<2x32x128xf32>
    %74 = arith.mulf %73, %69 : vector<2x32x128xf32>
    %75 = arith.mulf %74, %69 : vector<2x32x128xf32>
    %76 = arith.addf %69, %75 : vector<2x32x128xf32>
    %cst_32 = arith.constant 0.797884583 : f32
    %77 = vector.broadcast %cst_32 : f32 to vector<2x32x128xf32>
    %78 = arith.mulf %77, %76 : vector<2x32x128xf32>
    %79 = math.tanh %78 : vector<2x32x128xf32>
    %cst_33 = arith.constant 1.000000e+00 : f32
    %80 = vector.broadcast %cst_33 : f32 to vector<2x32x128xf32>
    %81 = arith.addf %80, %79 : vector<2x32x128xf32>
    %82 = arith.mulf %71, %81 : vector<2x32x128xf32>
    %83 = arith.truncf %82 : vector<2x32x128xf32> to vector<2x32x128xbf16>
    "tpu.trace_start"() <{level = 10 : i32, message = "bch,bht->bct"}> : () -> ()
    %cst_34 = arith.constant dense<0.000000e+00> : vector<2x8x128xf32>
    %84 = tpu.matmul %8, %83, %cst_34 {dimension_numbers = #tpu.dot_dimension_numbers<[2], [1], [1], [2], [0, 0, 0, 1, 1, 2], [0], [0]>} : vector<2x8x32xbf16>, vector<2x32x128xbf16>, vector<2x8x128xf32> -> vector<2x8x128xf32>
    "tpu.trace_stop"() : () -> ()
    %85 = arith.addf %66, %84 : vector<2x8x128xf32>
    %86 = arith.addf %85, %18 : vector<2x8x128xf32>
    %87 = vector.shape_cast %86 : vector<2x8x128xf32> to vector<16x128xf32>
    %88 = arith.truncf %87 : vector<16x128xf32> to vector<16x128xbf16>
    %cst_35 = arith.constant dense<0.000000e+00> : vector<16x32xf32>
    %89 = tpu.matmul %88, %9, %cst_35 {dimension_numbers = #tpu.dot_dimension_numbers<[1], [0], [0], [1], [0, 0, 1, 1], [], []>} : vector<16x128xbf16>, vector<128x32xbf16>, vector<16x32xf32> -> vector<16x32xf32>
    %90 = arith.addf %89, %21 : vector<16x32xf32>
    %cst_36 = arith.constant 5.000000e-01 : f32
    %91 = vector.broadcast %cst_36 : f32 to vector<16x32xf32>
    %92 = arith.mulf %91, %90 : vector<16x32xf32>
    %cst_37 = arith.constant 4.471500e-02 : f32
    %93 = vector.broadcast %cst_37 : f32 to vector<16x32xf32>
    %94 = arith.mulf %93, %90 : vector<16x32xf32>
    %95 = arith.mulf %94, %90 : vector<16x32xf32>
    %96 = arith.mulf %95, %90 : vector<16x32xf32>
    %97 = arith.addf %90, %96 : vector<16x32xf32>
    %cst_38 = arith.constant 0.797884583 : f32
    %98 = vector.broadcast %cst_38 : f32 to vector<16x32xf32>
    %99 = arith.mulf %98, %97 : vector<16x32xf32>
    %100 = math.tanh %99 : vector<16x32xf32>
    %cst_39 = arith.constant 1.000000e+00 : f32
    %101 = vector.broadcast %cst_39 : f32 to vector<16x32xf32>
    %102 = arith.addf %101, %100 : vector<16x32xf32>
    %103 = arith.mulf %92, %102 : vector<16x32xf32>
    %104 = arith.truncf %103 : vector<16x32xf32> to vector<16x32xbf16>
    %cst_40 = arith.constant dense<0.000000e+00> : vector<16x128xf32>
    %105 = tpu.matmul %104, %10, %cst_40 {dimension_numbers = #tpu.dot_dimension_numbers<[1], [0], [0], [1], [0, 0, 1, 1], [], []>} : vector<16x32xbf16>, vector<32x128xbf16>, vector<16x128xf32> -> vector<16x128xf32>
    %106 = arith.addf %87, %105 : vector<16x128xf32>
    %107 = arith.addf %106, %24 : vector<16x128xf32>
    %108 = vector.shape_cast %107 : vector<16x128xf32> to vector<2x8x128xf32>
    %c0_41 = arith.constant 0 : index
    %c0_42 = arith.constant 0 : index
    %c0_43 = arith.constant 0 : index
    %109 = vector.load %arg10[%c0_41, %c0_42, %c0_43] : memref<2x8x128xf32, #tpu.memory_space<vmem>>, vector<2x8x128xf32>
    tpu.vector_store %arg10[%c0_41, %c0_42, %c0_43], %108 {strides = array<i32>} : memref<2x8x128xf32, #tpu.memory_space<vmem>>, vector<2x8x128xf32>,
    return
  }
  func.func @transform_0(%arg0: i32) -> (i32, i32, i32) {
    %c0_i32 = arith.constant 0 : i32
    %c0_i32_0 = arith.constant 0 : i32
    %c0_i32_1 = arith.constant 0 : i32
    return %arg0, %c0_i32, %c0_i32_0 : i32, i32, i32
  }
  func.func @transform_1(%arg0: i32) -> (i32, i32) {
    %c0_i32 = arith.constant 0 : i32
    %c0_i32_0 = arith.constant 0 : i32
    %c0_i32_1 = arith.constant 0 : i32
    return %c0_i32, %c0_i32_0 : i32, i32
  }
  func.func @transform_2(%arg0: i32) -> (i32, i32) {
    %c0_i32 = arith.constant 0 : i32
    %c0_i32_0 = arith.constant 0 : i32
    %c0_i32_1 = arith.constant 0 : i32
    return %c0_i32, %c0_i32_0 : i32, i32
  }
  func.func @transform_3(%arg0: i32) -> (i32, i32) {
    %c0_i32 = arith.constant 0 : i32
    %c0_i32_0 = arith.constant 0 : i32
    %c0_i32_1 = arith.constant 0 : i32
    return %c0_i32, %c0_i32_0 : i32, i32
  }
  func.func @transform_4(%arg0: i32) -> (i32, i32) {
    %c0_i32 = arith.constant 0 : i32
    %c0_i32_0 = arith.constant 0 : i32
    %c0_i32_1 = arith.constant 0 : i32
    return %c0_i32, %c0_i32_0 : i32, i32
  }
  func.func @transform_5(%arg0: i32) -> (i32, i32) {
    %c0_i32 = arith.constant 0 : i32
    %c0_i32_0 = arith.constant 0 : i32
    %c0_i32_1 = arith.constant 0 : i32
    return %c0_i32, %c0_i32_0 : i32, i32
  }
  func.func @transform_6(%arg0: i32) -> (i32, i32) {
    %c0_i32 = arith.constant 0 : i32
    %c0_i32_0 = arith.constant 0 : i32
    %c0_i32_1 = arith.constant 0 : i32
    return %c0_i32, %c0_i32_0 : i32, i32
  }
  func.func @transform_7(%arg0: i32) -> (i32, i32) {
    %c0_i32 = arith.constant 0 : i32
    %c0_i32_0 = arith.constant 0 : i32
    %c0_i32_1 = arith.constant 0 : i32
    return %c0_i32, %c0_i32_0 : i32, i32
  }
  func.func @transform_8(%arg0: i32) -> (i32, i32) {
    %c0_i32 = arith.constant 0 : i32
    %c0_i32_0 = arith.constant 0 : i32
    %c0_i32_1 = arith.constant 0 : i32
    return %c0_i32, %c0_i32_0 : i32, i32
  }
  func.func @transform_9(%arg0: i32) -> (i32, i32, i32) {
    %c0_i32 = arith.constant 0 : i32
    %c0_i32_0 = arith.constant 0 : i32
    %c0_i32_1 = arith.constant 0 : i32
    return %arg0, %c0_i32, %c0_i32_0 : i32, i32, i32
  }
}

</mosaic_0001>

<bundles_post_ra>
// kernel: tpu_custom_call.1
= control target key start
LH: loop header
LB: loop body
LE: loop exit
PB: predicated region body
PF: predicated region fallthrough
CT: control target
= control target key end

     0   :  { %vm124_vm0 = vcmask 1043456   ;;  %vm117_vm1 = vcmask 64512   ;;  %v1231_v5 = vmov 0   ;;  %s1642_s0 = inlined_call_operand.vmem [shape: f32[2,8,128], index: 0, kind: input, shape index: {}]   ;;  %s1643_s1 = inlined_call_operand.vmem [shape: bf16[32,8], index: 1, kind: input, shape index: {}]   ;;  %s1644_s2 = inlined_call_operand.vmem [shape: f32[32,1], index: 2, kind: input, shape index: {}]   ;;  %s1645_s3 = inlined_call_operand.vmem [shape: bf16[8,32], index: 3, kind: input, shape index: {}]   ;;  %s1646_s4 = inlined_call_operand.vmem [shape: f32[8,1], index: 4, kind: input, shape index: {}]   ;;  %s1647_s5 = inlined_call_operand.vmem [shape: bf16[128,32], index: 5, kind: input, shape index: {}]   ;;  %s1648_s6 = inlined_call_operand.vmem [shape: f32[1,32], index: 6, kind: input, shape index: {}]   ;;  %s1649_s7 = inlined_call_operand.vmem [shape: bf16[32,128], index: 7, kind: input, shape index: {}]   ;;  %s1650_s8 = inlined_call_operand.vmem [shape: f32[1,128], index: 8, kind: input, shape index: {}]   ;;  %s1651_s9 = inlined_call_operand.hbm [shape: f32[2,8,128], index: 9, kind: output, shape index: {}]  }
   0x1   :  { %v1290_v0 = vld [vmem:[%s1642_s0] sm:$0xff]  ;;  %v1295_v1 = vld [vmem:[%s1642_s0 + $0x8] sm:$0xff]  ;;  %1153 = vset.pattern.permute.xlu0 %v1231_v5  ;;  %1154 = vset.pattern.permute.xlu1 %v1231_v5  ;;  %v63_v10 = vld [vmem:[%s1644_s2 + $0x10] sm:$0xff] }
   0x2   :  { %v105_v2 = vpack.c.bf16 %v1290_v0, %v1290_v0  ;;  %v106_v3 = vpack.c.bf16 %v1295_v1, %v1295_v1  ;;  %v1304_v4 = vld [vmem:[%s1643_s1] sm:$0xff]   ;;  %v1313_v8 = vld [vmem:[%s1643_s1 + $0x8] sm:$0xff]   ;;  %v64_v12 = vld [vmem:[%s1644_s2 + $0x18] sm:$0xff]  ;;  %77 = vperm.xlu1 %1154, %v63_v10  }
   0x3   :  { %v61_v9 = vld [vmem:[%s1644_s2] sm:$0xff]  ;;  %1033 = vmatprep.mubr.msk.bf16.mxu0 %vm117_vm1, %v1304_v4  ;;  %1039 = vmatprep.mubr.msk.bf16.mxu1 %vm117_vm1, %v1304_v4  ;;  %v62_v11 = vld [vmem:[%s1644_s2 + $0x8] sm:$0xff] }
   0x4   :  { %1143 = vmatprep.subr.msk.bf16.mxu0 %vm124_vm0, %v105_v2  ;;  %1144 = vmatprep.subr.msk.bf16.mxu1 %vm124_vm0, %v106_v3  ;;  %v126_v6 = vsel %vm124_vm0, %v105_v2, 0  ;;  %v178_v7 = vsel %vm124_vm0, %v106_v3, 0  ;;  %v85_v13 = vld [vmem:[%s1646_s4] sm:$0xff] }
   0x5   :  { %1032 = vmatpush3.bf16.msra.mxu0 %v126_v6  ;;  %1038 = vmatpush3.bf16.msra.mxu1 %v178_v7 }
   0x6   :  { %67 = vperm.xlu0 %1153, %v61_v9   ;;  %82 = vperm.xlu1 %1154, %v64_v12  }
   0x8   :  { %1034 = vmatmul.mubr.msk.bf16.vlgmr.msra.gmra.mrb[0].mxu0 %vm117_vm1, %v1313_v8  ;;  %1040 = vmatmul.mubr.msk.bf16.vlgmr.msra.gmra.mrb[0].mxu1 %vm117_vm1, %v1313_v8 }
   0xa   :  { %72 = vperm.xlu0 %1153, %v62_v11  }
   0xb   :  { %14 = vsyncpa [#allocation3], 0  ;;  %v1232_v14 = vmov 0.0   ;;  %vm1233_vm2 = vmmov 0   ;;  %vm305_vm3 = vcmask 261120  }
   0xc   :  { %1043 = vmatprep.subr.bf16.mxu0 %v1232_v14  ;;  %1079 = vmatprep.subr.bf16.mxu1 %v1232_v14 }
   0xd   :  { %1047 = vmatprep.mubr.msk.bf16.mxu0 %vm1233_vm2, %v1232_v14  ;;  %1083 = vmatprep.mubr.msk.bf16.mxu1 %vm1233_vm2, %v1232_v14 }
   0xe   :  { %88 = vperm.xlu0 %1153, %v85_v13  }
  0x81   :  { %v1346_v16 = vpop.permute.xlu1 %77 }
  0x85   :  { %v1344_v15 = vpop.permute.xlu0 %67  ;;  %v1350_v18 = vpop.permute.xlu1 %82 }
  0x89   :  { %v1348_v17 = vpop.permute.xlu0 %72 }
  0xdb   :  { %v1035_v19 = vpop.f32.mrb[0].mxu0  ;;  %v1041_v20 = vpop.f32.mrb[0].mxu1 }
  0xdc   :  { %v1353_v21 = vadd.f32 %v1035_v19, %v1346_v16  ;;  %v1356_v22 = vadd.f32 %v1041_v20, %v1346_v16  ;;  %v162_v23 = vpop.f32.mrb[1].mxu0  ;;  %v214_v24 = vpop.f32.mrb[1].mxu1 }
  0xdd   :  { %v1359_v25 = vadd.f32 %v162_v23, %v1344_v15  ;;  %v1362_v26 = vadd.f32 %v214_v24, %v1344_v15  ;;  %v1036_v27 = vpop.f32.mrb[2].mxu0  ;;  %v1042_v28 = vpop.f32.mrb[2].mxu1 }
  0xde   :  { %v239_v29 = vmul.f32 0.044715, %v1353_v21  ;;  %v243_v30 = vmul.f32 0.044715, %v1356_v22  ;;  %v1367_v31 = vadd.f32 %v1036_v27, %v1350_v18  ;;  %v1370_v32 = vadd.f32 %v1042_v28, %v1350_v18  ;;  %v165_v33 = vpop.f32.mrb[3].mxu0  ;;  %v217_v34 = vpop.f32.mrb[3].mxu1 }
  0xdf   :  { %v237_v35 = vmul.f32 0.044715, %v1359_v25  ;;  %v241_v36 = vmul.f32 0.044715, %v1362_v26  ;;  %v166_v37 = vadd.f32 %v165_v33, %v1348_v17  ;;  %v1376_v38 = vadd.f32 %v217_v34, %v1348_v17 }
  0xe0   :  { %v247_v39 = vmul.f32 %v239_v29, %v1353_v21  ;;  %v251_v40 = vmul.f32 %v243_v30, %v1356_v22  ;;  %v240_v41 = vmul.f32 0.044715, %v1367_v31  ;;  %v244_v42 = vmul.f32 0.044715, %v1370_v32 }
  0xe1   :  { %v245_v43 = vmul.f32 %v237_v35, %v1359_v25  ;;  %v249_v44 = vmul.f32 %v241_v36, %v1362_v26  ;;  %v238_v45 = vmul.f32 0.044715, %v166_v37  ;;  %v242_v46 = vmul.f32 0.044715, %v1376_v38 }
  0xe2   :  { %v255_v47 = vmul.f32 %v247_v39, %v1353_v21  ;;  %v259_v48 = vmul.f32 %v251_v40, %v1356_v22  ;;  %v248_v49 = vmul.f32 %v240_v41, %v1367_v31  ;;  %v252_v50 = vmul.f32 %v244_v42, %v1370_v32 }
  0xe3   :  { %v253_v51 = vmul.f32 %v245_v43, %v1359_v25  ;;  %v257_v52 = vmul.f32 %v249_v44, %v1362_v26  ;;  %v246_v53 = vmul.f32 %v238_v45, %v166_v37  ;;  %v250_v54 = vmul.f32 %v242_v46, %v1376_v38 }
  0xe4   :  { %v263_v55 = vadd.f32 %v255_v47, %v1353_v21  ;;  %v267_v56 = vadd.f32 %v259_v48, %v1356_v22  ;;  %v256_v57 = vmul.f32 %v248_v49, %v1367_v31  ;;  %v260_v58 = vmul.f32 %v252_v50, %v1370_v32 }
  0xe5   :  { %v261_v59 = vadd.f32 %v253_v51, %v1359_v25  ;;  %v265_v60 = vadd.f32 %v257_v52, %v1362_v26  ;;  %v254_v61 = vmul.f32 %v246_v53, %v166_v37  ;;  %v258_v62 = vmul.f32 %v250_v54, %v1376_v38 }
  0xe6   :  { %v271_v63 = vmul.f32 0.7978846, %v263_v55  ;;  %v275_v2 = vmul.f32 0.7978846, %v267_v56  ;;  %v264_v3 = vadd.f32 %v256_v57, %v1367_v31  ;;  %v268_v5 = vadd.f32 %v260_v58, %v1370_v32  ;;  %v1433_v58 = vld [vmem:[%s1647_s5 + $0x8] sm:$0xff]  }
  0xe7   :  { %v269_v6 = vmul.f32 0.7978846, %v261_v59  ;;  %v273_v7 = vmul.f32 0.7978846, %v265_v60  ;;  %v262_v9 = vadd.f32 %v254_v61, %v166_v37  ;;  %v266_v10 = vadd.f32 %v258_v62, %v1376_v38  ;;  %v1442_v59 = vld [vmem:[%s1647_s5 + $0x10] sm:$0xff]   ;;  %v1449_v60 = vld [vmem:[%s1647_s5 + $0x18] sm:$0xff]  }
  0xe8   :  { %1167 = vtanh.f32 %v271_v63  ;;  %v272_v11 = vmul.f32 0.7978846, %v264_v3  ;;  %v276_v12 = vmul.f32 0.7978846, %v268_v5  ;;  %v229_v30 = vmul.f32 0.5, %v1359_v25  ;;  %v1457_v61 = vld [vmem:[%s1647_s5 + $0x20] sm:$0xff]  }
  0xe9   :  { %1169 = vtanh.f32 %v275_v2  ;;  %v270_v13 = vmul.f32 0.7978846, %v262_v9  ;;  %v274_v19 = vmul.f32 0.7978846, %v266_v10  ;;  %v230_v33 = vmul.f32 0.5, %v166_v37  ;;  %v1463_v62 = vld [vmem:[%s1647_s5 + $0x28] sm:$0xff]  }
  0xea   :  { %1171 = vtanh.f32 %v269_v6  ;;  %v231_v39 = vmul.f32 0.5, %v1353_v21  ;;  %v232_v40 = vmul.f32 0.5, %v1367_v31  ;;  %v235_v44 = vmul.f32 0.5, %v1356_v22  ;;  %v1471_v63 = vld [vmem:[%s1647_s5 + $0x30] sm:$0xff]   ;;  %v1477_v2 = vld [vmem:[%s1647_s5 + $0x38] sm:$0xff]  }
  0xeb   :  { %1173 = vtanh.f32 %v273_v7  ;;  %v236_v45 = vmul.f32 0.5, %v1370_v32  ;;  %v233_v37 = vmul.f32 0.5, %v1362_v26  ;;  %v234_v50 = vmul.f32 0.5, %v1376_v38  ;;  %v1413_v26 = vld [vmem:[%s1645_s3] sm:$0xf] }
  0xec   :  { %1175 = vtanh.f32 %v272_v11  ;;  %v1424_v38 = vld [vmem:[%s1647_s5] sm:$0xff]  }
  0xed   :  { %1177 = vtanh.f32 %v276_v12 }
  0xee   :  { %1179 = vtanh.f32 %v270_v13  ;;  %v1484_v13 = vpop.permute.xlu0 %88 }
  0xef   :  { %1181 = vtanh.f32 %v274_v19 }
  0xf2   :  { %v1168_v20 = vpop.eup %1167 }
  0xf3   :  { %v1170_v23 = vpop.eup %1169  ;;  %v287_v28 = vadd.f32 1.0, %v1168_v20 }
  0xf4   :  { %v1172_v24 = vpop.eup %1171  ;;  %v291_v34 = vadd.f32 1.0, %v1170_v23 }
  0xf5   :  { %v1174_v27 = vpop.eup %1173  ;;  %v285_v36 = vadd.f32 1.0, %v1172_v24  ;;  %v295_v49 = vmul.f32 %v287_v28, %v231_v39  ;;  %v1506_v28 = vld [vmem:[%s1648_s6] ss:$0 sm:$0xff] }
  0xf6   :  { %v1176_v29 = vpop.eup %1175  ;;  %v289_v43 = vadd.f32 1.0, %v1174_v27  ;;  %v299_v21 = vmul.f32 %v291_v34, %v235_v44 }
  0xf7   :  { %v1178_v35 = vpop.eup %1177  ;;  %v288_v41 = vadd.f32 1.0, %v1176_v29  ;;  %v293_v31 = vmul.f32 %v285_v36, %v229_v30 }
  0xf8   :  { %v1180_v42 = vpop.eup %1179  ;;  %v292_v46 = vadd.f32 1.0, %v1178_v35  ;;  %v297_v55 = vmul.f32 %v289_v43, %v233_v37 }
  0xf9   :  { %v1182_v47 = vpop.eup %1181  ;;  %v286_v48 = vadd.f32 1.0, %v1180_v42  ;;  %v296_v25 = vmul.f32 %v288_v41, %v232_v40 }
  0xfa   :  { %v290_v51 = vadd.f32 1.0, %v1182_v47  ;;  %v300_v52 = vmul.f32 %v292_v46, %v236_v45 }
  0xfb   :  { %v294_v53 = vmul.f32 %v286_v48, %v230_v33  ;;  %v302_v54 = vpack.c.bf16 %v296_v25, %v295_v49 }
  0xfc   :  { %v298_v56 = vmul.f32 %v290_v51, %v234_v50  ;;  %v304_v22 = vpack.c.bf16 %v300_v52, %v299_v21 }
  0xfd   :  { %v301_v57 = vpack.c.bf16 %v294_v53, %v293_v31 }
  0xfe   :  { %v303_v32 = vpack.c.bf16 %v298_v56, %v297_v55 }
  0xff   :  { %1044 = vmatpush3.bf16.msra.mxu0 %v301_v57 }
 0x100   :  { %1045 = vmatprep.subr.bf16.mxu0 %v1232_v14 }
 0x103   :  { %1046 = vmatpush3.bf16.msra.mxu0 %v302_v54  ;;  %v1516_v54 = vld [vmem:[%s1650_s8] ss:$0 sm:$0xff]  ;;  %s1234_s8 = smov [#allocation2]  }
 0x104   :  { %1051 = vmatprep.subr.bf16.mxu0 %v1232_v14  ;;  %s944_s22 = sshll.u32 %s1234_s8, 4  ;;  %s945_s22 = int_to_ptr.vmem [resolvable:$true] %s944_s22 }
 0x105   :  { %s1207_s23 = scalar_lea.vmem %s945_s22, 256  ;;  %p1212_p1 = scmp.lt.s32.totalorder %s945_s22, %s945_s22 }
 0x106   :  { %1048 = vmatmul.mubr.msk.bf16.vlgmr.msra.gmra.mrb[4].mxu0 %vm305_vm3, %v1413_v26  ;;  %p1208_p0 = scmp.ne.s32.totalorder %s945_s22, %s1207_s23  ;;  %p1213_p2 = scmp.lt.s32.totalorder %s1207_s23, %s1207_s23 }
 0x107   :  { %1052 = vmatpush3.bf16.msra.mxu0 %v303_v32  ;;  %1055 = vmatprep.mubr.msk.bf16.mxu0 %vm1233_vm2, %v1232_v14 }
 0x108   :  { %1053 = vmatprep.subr.bf16.mxu0 %v1232_v14  ;;  %p1214_p3 = por %p1213_p2, %p1212_p1 }
 0x10a   :  { %p1215_p4 = pnand %p1214_p3, %p1208_p0 }
 0x10b   :  { %1054 = vmatpush3.bf16.msra.mxu0 %v304_v22 }
 0x10c   :  { %1059 = vmatprep.subr.bf16.mxu0 %v1232_v14 }
 0x10e   :  { %1056 = vmatmul.mubr.msk.bf16.vlgmr.msra.gmra.mrb[8].mxu0 %vm305_vm3, %v1413_v26 }
 0x10f   :  { %1060 = vmatpush3.bf16.msra.mxu0 %v1424_v38  ;;  %1075 = vmatprep.mubr.msk.bf16.mxu0 %vm1233_vm2, %v1232_v14 }
 0x110   :  { %1061 = vmatprep.subr.bf16.mxu0 %v1232_v14 }
 0x113   :  { %1062 = vmatpush3.bf16.msra.mxu0 %v1433_v58 }
 0x114   :  { %1063 = vmatprep.subr.bf16.mxu0 %v1232_v14 }
 0x117   :  { %1064 = vmatpush3.bf16.msra.mxu0 %v1442_v59 }
 0x118   :  { %1065 = vmatprep.subr.bf16.mxu0 %v1232_v14 }
 0x11b   :  { %1066 = vmatpush3.bf16.msra.mxu0 %v1449_v60 }
 0x11c   :  { %1067 = vmatprep.subr.bf16.mxu0 %v1232_v14 }
 0x11f   :  { %1068 = vmatpush3.bf16.msra.mxu0 %v1457_v61 }
 0x120   :  { %1069 = vmatprep.subr.bf16.mxu0 %v1232_v14 }
 0x123   :  { %1070 = vmatpush3.bf16.msra.mxu0 %v1463_v62 }
 0x124   :  { %1071 = vmatprep.subr.bf16.mxu0 %v1232_v14 }
 0x127   :  { %1072 = vmatpush3.bf16.msra.mxu0 %v1471_v63 }
 0x128   :  { %1073 = vmatprep.subr.bf16.mxu0 %v1232_v14 }
 0x12b   :  { %1074 = vmatpush3.bf16.msra.mxu0 %v1477_v2 }
 0x12c   :  { %1107 = vmatprep.subr.bf16.mxu0 %v1232_v14 }
 0x1d9   :  { %v343_v3 = vpop.f32.mrb[4].mxu0 }
 0x1da   :  { %v1049_v5 = vpop.f32.mrb[5].mxu0  ;;  %v389_v9 = vadd.f32 %v343_v3, %v1290_v0  ;;  %v1493_v0 = vld [vmem:[%s1649_s7] sm:$0xff]  }
 0x1db   :  { %v346_v6 = vpop.f32.mrb[6].mxu0  ;;  %1080 = vmatpush3.bf16.msra.mxu1 %v1493_v0 }
 0x1dc   :  { %v1050_v7 = vpop.f32.mrb[7].mxu0  ;;  %v391_v20 = vadd.f32 %v389_v9, %v1484_v13  ;;  %1081 = vmatprep.subr.bf16.mxu1 %v1232_v14 }
 0x1e1   :  { %v383_v10 = vpop.f32.mrb[8].mxu0 }
 0x1e2   :  { %v390_v11 = vadd.f32 %v383_v10, %v1295_v1  ;;  %v1057_v12 = vpop.f32.mrb[9].mxu0  ;;  %v1499_v1 = vld [vmem:[%s1649_s7 + $0x8] sm:$0xff]  }
 0x1e3   :  { %v386_v19 = vpop.f32.mrb[10].mxu0  ;;  %1082 = vmatpush3.bf16.msra.mxu1 %v1499_v1 }
 0x1e4   :  { %v392_v23 = vadd.f32 %v390_v11, %v1484_v13  ;;  %v1058_v24 = vpop.f32.mrb[11].mxu0 }
 0x1e6   :  { %v393_v27 = vpack.c.bf16 %v392_v23, %v391_v20 }
 0x1e8   :  { %1076 = vmatmul.mubr.bf16.vlgmr.msra.gmra.mrb[12].mxu0 %v393_v27 }
 0x1e9   :  { %1111 = vmatprep.mubr.msk.bf16.mxu0 %vm1233_vm2, %v1232_v14 }
 0x2bb   :  { %v476_v29 = vpop.f32.mrb[12].mxu0 }
 0x2bc   :  { %v477_v30 = vadd.f32 %v1506_v28, %v476_v29  ;;  %v1077_v33 = vpop.f32.mrb[13].mxu0 }
 0x2bd   :  { %v479_v34 = vpop.f32.mrb[14].mxu0 }
 0x2be   :  { %v485_v35 = vmul.f32 0.044715, %v477_v30  ;;  %v480_v36 = vadd.f32 %v1506_v28, %v479_v34  ;;  %v1078_v39 = vpop.f32.mrb[15].mxu0  ;;  %v483_v50 = vmul.f32 0.5, %v477_v30 }
 0x2c0   :  { %v487_v40 = vmul.f32 %v485_v35, %v477_v30  ;;  %v486_v41 = vmul.f32 0.044715, %v480_v36  ;;  %v484_v51 = vmul.f32 0.5, %v480_v36 }
 0x2c2   :  { %v489_v42 = vmul.f32 %v487_v40, %v477_v30  ;;  %v488_v43 = vmul.f32 %v486_v41, %v480_v36 }
 0x2c4   :  { %v491_v44 = vadd.f32 %v489_v42, %v477_v30  ;;  %v490_v45 = vmul.f32 %v488_v43, %v480_v36 }
 0x2c6   :  { %v493_v46 = vmul.f32 0.7978846, %v491_v44  ;;  %v492_v47 = vadd.f32 %v490_v45, %v480_v36 }
 0x2c8   :  { %1183 = vtanh.f32 %v493_v46  ;;  %v494_v48 = vmul.f32 0.7978846, %v492_v47 }
 0x2ca   :  { %1185 = vtanh.f32 %v494_v48 }
 0x2d2   :  { %v1184_v49 = vpop.eup %1183 }
 0x2d3   :  { %v497_v25 = vadd.f32 1.0, %v1184_v49 }
 0x2d4   :  { %v1186_v37 = vpop.eup %1185 }
 0x2d5   :  { %v498_v21 = vadd.f32 1.0, %v1186_v37  ;;  %v499_v52 = vmul.f32 %v497_v25, %v483_v50 }
 0x2d7   :  { %v500_v31 = vmul.f32 %v498_v21, %v484_v51 }
 0x2d9   :  { %v501_v53 = vpack.c.bf16 %v500_v31, %v499_v52 }
 0x2db   :  { %1084 = vmatmul.mubr.msk.bf16.vlgmr.msra.gmra.mrb[4].mxu1 %vm305_vm3, %v501_v53 }
 0x2dc   :  { %1089 = vmatprep.mubr.msk.bf16.mxu1 %vm117_vm1, %v1304_v4 }
 0x3ae   :  { %v551_v55 = vpop.f32.mrb[4].mxu1 }
 0x3af   :  { %v558_v56 = vadd.f32 %v551_v55, %v391_v20  ;;  %v1085_v22 = vpop.f32.mrb[5].mxu1 }
 0x3b0   :  { %v554_v57 = vpop.f32.mrb[6].mxu1 }
 0x3b1   :  { %v1519_v32 = vadd.f32 %v1516_v54, %v558_v56  ;;  %v559_v3 = vadd.f32 %v554_v57, %v392_v23  ;;  %v1086_v5 = vpop.f32.mrb[7].mxu1 }
 0x3b3   :  { %v562_v6 = vpack.c.bf16 %v1519_v32, %v1519_v32  ;;  %v1524_v7 = vadd.f32 %v1516_v54, %v559_v3 }
 0x3b5   :  { %v563_v9 = vpack.c.bf16 %v1524_v7, %v1524_v7  ;;  %1145 = vmatprep.subr.msk.bf16.mxu1 %vm124_vm0, %v562_v6  ;;  %v565_v10 = vsel %vm124_vm0, %v562_v6, 0 }
 0x3b6   :  { %1088 = vmatpush3.bf16.msra.mxu1 %v565_v10 }
 0x3b7   :  { %1146 = vmatprep.subr.msk.bf16.mxu1 %vm124_vm0, %v563_v9  ;;  %v617_v11 = vsel %vm124_vm0, %v563_v9, 0 }
 0x3b9   :  { %1090 = vmatmul.mubr.msk.bf16.vlgmr.msra.gmra.mrb[8].mxu1 %vm117_vm1, %v1313_v8 }
 0x3ba   :  { %1094 = vmatpush3.bf16.msra.mxu1 %v617_v11  ;;  %1095 = vmatprep.mubr.msk.bf16.mxu1 %vm117_vm1, %v1304_v4 }
 0x3bb   :  { %1099 = vmatprep.subr.bf16.mxu1 %v1232_v14 }
 0x3c1   :  { %1096 = vmatmul.mubr.msk.bf16.vlgmr.msra.gmra.mrb[12].mxu1 %vm117_vm1, %v1313_v8 }
 0x3c2   :  { %1103 = vmatprep.mubr.msk.bf16.mxu1 %vm1233_vm2, %v1232_v14 }
 0x48c   :  { %v1091_v12 = vpop.f32.mrb[8].mxu1 }
 0x48d   :  { %v1542_v19 = vadd.f32 %v1091_v12, %v1346_v16  ;;  %v601_v20 = vpop.f32.mrb[9].mxu1 }
 0x48e   :  { %v1545_v23 = vadd.f32 %v601_v20, %v1344_v15  ;;  %v1092_v24 = vpop.f32.mrb[10].mxu1 }
 0x48f   :  { %v678_v27 = vmul.f32 0.044715, %v1542_v19  ;;  %v1549_v4 = vadd.f32 %v1092_v24, %v1350_v18  ;;  %v604_v29 = vpop.f32.mrb[11].mxu1 }
 0x490   :  { %v676_v8 = vmul.f32 0.044715, %v1545_v23  ;;  %v1553_v30 = vadd.f32 %v604_v29, %v1348_v17 }
 0x491   :  { %v686_v33 = vmul.f32 %v678_v27, %v1542_v19  ;;  %v679_v34 = vmul.f32 0.044715, %v1549_v4 }
 0x492   :  { %v684_v35 = vmul.f32 %v676_v8, %v1545_v23  ;;  %v677_v36 = vmul.f32 0.044715, %v1553_v30 }
 0x493   :  { %v694_v39 = vmul.f32 %v686_v33, %v1542_v19  ;;  %v687_v40 = vmul.f32 %v679_v34, %v1549_v4 }
 0x494   :  { %v692_v41 = vmul.f32 %v684_v35, %v1545_v23  ;;  %v685_v42 = vmul.f32 %v677_v36, %v1553_v30  ;;  %v1097_v43 = vpop.f32.mrb[12].mxu1 }
 0x495   :  { %v702_v44 = vadd.f32 %v694_v39, %v1542_v19  ;;  %v695_v45 = vmul.f32 %v687_v40, %v1549_v4  ;;  %v1566_v46 = vadd.f32 %v1097_v43, %v1346_v16  ;;  %v653_v47 = vpop.f32.mrb[13].mxu1 }
 0x496   :  { %v700_v48 = vadd.f32 %v692_v41, %v1545_v23  ;;  %v693_v49 = vmul.f32 %v685_v42, %v1553_v30  ;;  %v1571_v25 = vadd.f32 %v653_v47, %v1344_v15  ;;  %v1098_v37 = vpop.f32.mrb[14].mxu1 }
 0x497   :  { %v710_v50 = vmul.f32 0.7978846, %v702_v44  ;;  %v703_v51 = vadd.f32 %v695_v45, %v1549_v4  ;;  %v682_v21 = vmul.f32 0.044715, %v1566_v46  ;;  %v665_v52 = vadd.f32 %v1098_v37, %v1350_v18  ;;  %v656_v31 = vpop.f32.mrb[15].mxu1 }
 0x498   :  { %v708_v53 = vmul.f32 0.7978846, %v700_v48  ;;  %v701_v16 = vadd.f32 %v693_v49, %v1553_v30  ;;  %v680_v55 = vmul.f32 0.044715, %v1571_v25  ;;  %v657_v56 = vadd.f32 %v656_v31, %v1348_v17 }
 0x499   :  { %1187 = vtanh.f32 %v710_v50  ;;  %v711_v22 = vmul.f32 0.7978846, %v703_v51  ;;  %v690_v15 = vmul.f32 %v682_v21, %v1566_v46  ;;  %v683_v57 = vmul.f32 0.044715, %v665_v52 }
 0x49a   :  { %1189 = vtanh.f32 %v708_v53  ;;  %v709_v3 = vmul.f32 0.7978846, %v701_v16  ;;  %v688_v5 = vmul.f32 %v680_v55, %v1571_v25  ;;  %v681_v6 = vmul.f32 0.044715, %v657_v56 }
 0x49b   :  { %1191 = vtanh.f32 %v711_v22  ;;  %v698_v18 = vmul.f32 %v690_v15, %v1566_v46  ;;  %v691_v9 = vmul.f32 %v683_v57, %v665_v52  ;;  %v670_v44 = vmul.f32 0.5, %v1542_v19 }
 0x49c   :  { %1193 = vtanh.f32 %v709_v3  ;;  %v696_v10 = vmul.f32 %v688_v5, %v1571_v25  ;;  %v689_v11 = vmul.f32 %v681_v6, %v657_v56  ;;  %v671_v45 = vmul.f32 0.5, %v1549_v4 }
 0x49d   :  { %v706_v17 = vadd.f32 %v698_v18, %v1566_v46  ;;  %v699_v12 = vmul.f32 %v691_v9, %v665_v52  ;;  %v668_v48 = vmul.f32 0.5, %v1545_v23  ;;  %v669_v49 = vmul.f32 0.5, %v1553_v30 }
 0x49e   :  { %v704_v20 = vadd.f32 %v696_v10, %v1571_v25  ;;  %v697_v24 = vmul.f32 %v689_v11, %v657_v56  ;;  %v674_v23 = vmul.f32 0.5, %v1566_v46  ;;  %v675_v4 = vmul.f32 0.5, %v665_v52 }
 0x49f   :  { %v714_v27 = vmul.f32 0.7978846, %v706_v17  ;;  %v707_v29 = vadd.f32 %v699_v12, %v665_v52  ;;  %v672_v5 = vmul.f32 0.5, %v1571_v25  ;;  %v673_v6 = vmul.f32 0.5, %v657_v56 }
 0x4a0   :  { %v712_v8 = vmul.f32 0.7978846, %v704_v20  ;;  %v705_v33 = vadd.f32 %v697_v24, %v657_v56 }
 0x4a1   :  { %1195 = vtanh.f32 %v714_v27  ;;  %v715_v34 = vmul.f32 0.7978846, %v707_v29 }
 0x4a2   :  { %1197 = vtanh.f32 %v712_v8  ;;  %v713_v35 = vmul.f32 0.7978846, %v705_v33 }
 0x4a3   :  { %v1188_v36 = vpop.eup %1187  ;;  %1199 = vtanh.f32 %v715_v34 }
 0x4a4   :  { %v1190_v39 = vpop.eup %1189  ;;  %1201 = vtanh.f32 %v713_v35  ;;  %v726_v40 = vadd.f32 1.0, %v1188_v36 }
 0x4a5   :  { %v1192_v41 = vpop.eup %1191  ;;  %v724_v42 = vadd.f32 1.0, %v1190_v39 }
 0x4a6   :  { %v1194_v43 = vpop.eup %1193  ;;  %v727_v47 = vadd.f32 1.0, %v1192_v41  ;;  %v734_v50 = vmul.f32 %v726_v40, %v670_v44 }
 0x4a7   :  { %v725_v37 = vadd.f32 1.0, %v1194_v43  ;;  %v732_v21 = vmul.f32 %v724_v42, %v668_v48 }
 0x4a8   :  { %v735_v51 = vmul.f32 %v727_v47, %v671_v45 }
 0x4a9   :  { %v733_v31 = vmul.f32 %v725_v37, %v669_v49 }
 0x4aa   :  { %v741_v53 = vpack.c.bf16 %v735_v51, %v734_v50 }
 0x4ab   :  { %v1196_v16 = vpop.eup %1195  ;;  %v740_v55 = vpack.c.bf16 %v733_v31, %v732_v21 }
 0x4ac   :  { %v1198_v22 = vpop.eup %1197  ;;  %v730_v15 = vadd.f32 1.0, %v1196_v16 }
 0x4ad   :  { %v1200_v57 = vpop.eup %1199  ;;  %1100 = vmatpush3.bf16.msra.mxu1 %v740_v55  ;;  %v728_v19 = vadd.f32 1.0, %v1198_v22 }
 0x4ae   :  { %v1202_v3 = vpop.eup %1201  ;;  %1101 = vmatprep.subr.bf16.mxu1 %v1232_v14  ;;  %v731_v30 = vadd.f32 1.0, %v1200_v57  ;;  %v738_v9 = vmul.f32 %v730_v15, %v674_v23 }
 0x4af   :  { %v729_v18 = vadd.f32 1.0, %v1202_v3  ;;  %v736_v11 = vmul.f32 %v728_v19, %v672_v5 }
 0x4b0   :  { %v739_v10 = vmul.f32 %v731_v30, %v675_v4 }
 0x4b1   :  { %1102 = vmatpush3.bf16.msra.mxu1 %v741_v53  ;;  %v737_v17 = vmul.f32 %v729_v18, %v673_v6 }
 0x4b2   :  { %v743_v12 = vpack.c.bf16 %v739_v10, %v738_v9  ;;  %1115 = vmatprep.subr.bf16.mxu1 %v1232_v14 }
 0x4b3   :  { %v742_v20 = vpack.c.bf16 %v737_v17, %v736_v11 }
 0x4b4   :  { %1104 = vmatmul.mubr.msk.bf16.vlgmr.msra.gmra.mrb[16].mxu1 %vm305_vm3, %v1413_v26 }
 0x4b5   :  { %1108 = vmatpush3.bf16.msra.mxu0 %v742_v20  ;;  %1116 = vmatpush3.bf16.msra.mxu1 %v1424_v38 }
 0x4b6   :  { %1109 = vmatprep.subr.bf16.mxu0 %v1232_v14  ;;  %1117 = vmatprep.subr.bf16.mxu1 %v1232_v14 }
 0x4b7   :  { %1131 = vmatprep.mubr.msk.bf16.mxu1 %vm1233_vm2, %v1232_v14 }
 0x4b9   :  { %1110 = vmatpush3.bf16.msra.mxu0 %v743_v12  ;;  %1118 = vmatpush3.bf16.msra.mxu1 %v1433_v58 }
 0x4ba   :  { %1119 = vmatprep.subr.bf16.mxu1 %v1232_v14  ;;  %1135 = vmatprep.subr.bf16.mxu0 %v1232_v14 }
 0x4bc   :  { %1112 = vmatmul.mubr.msk.bf16.vlgmr.msra.gmra.mrb[16].mxu0 %vm305_vm3, %v1413_v26 }
 0x4bd   :  { %1120 = vmatpush3.bf16.msra.mxu1 %v1442_v59  ;;  %1136 = vmatpush3.bf16.msra.mxu0 %v1493_v0 }
 0x4be   :  { %1121 = vmatprep.subr.bf16.mxu1 %v1232_v14  ;;  %1137 = vmatprep.subr.bf16.mxu0 %v1232_v14 }
 0x4bf   :  { %1139 = vmatprep.mubr.msk.bf16.mxu0 %vm1233_vm2, %v1232_v14 }
 0x4c1   :  { %1122 = vmatpush3.bf16.msra.mxu1 %v1449_v60  ;;  %1138 = vmatpush3.bf16.msra.mxu0 %v1499_v1 }
 0x4c2   :  { %1123 = vmatprep.subr.bf16.mxu1 %v1232_v14 }
 0x4c5   :  { %1124 = vmatpush3.bf16.msra.mxu1 %v1457_v61 }
 0x4c6   :  { %1125 = vmatprep.subr.bf16.mxu1 %v1232_v14 }
 0x4c9   :  { %1126 = vmatpush3.bf16.msra.mxu1 %v1463_v62 }
 0x4ca   :  { %1127 = vmatprep.subr.bf16.mxu1 %v1232_v14 }
 0x4cd   :  { %1128 = vmatpush3.bf16.msra.mxu1 %v1471_v63 }
 0x4ce   :  { %1129 = vmatprep.subr.bf16.mxu1 %v1232_v14 }
 0x4d1   :  { %1130 = vmatpush3.bf16.msra.mxu1 %v1477_v2 }
 0x587   :  { %v778_v26 = vpop.f32.mrb[16].mxu1 }
 0x588   :  { %v1105_v38 = vpop.f32.mrb[17].mxu1  ;;  %v824_v60 = vadd.f32 %v778_v26, %v1519_v32 }
 0x589   :  { %v781_v58 = vpop.f32.mrb[18].mxu1 }
 0x58a   :  { %v1106_v59 = vpop.f32.mrb[19].mxu1  ;;  %v826_v62 = vadd.f32 %v824_v60, %v1484_v13 }
 0x58f   :  { %v818_v0 = vpop.f32.mrb[16].mxu0 }
 0x590   :  { %v825_v61 = vadd.f32 %v818_v0, %v1524_v7  ;;  %v1113_v1 = vpop.f32.mrb[17].mxu0 }
 0x591   :  { %v821_v46 = vpop.f32.mrb[18].mxu0 }
 0x592   :  { %v827_v25 = vadd.f32 %v825_v61, %v1484_v13  ;;  %v1114_v63 = vpop.f32.mrb[19].mxu0 }
 0x594   :  { %v828_v52 = vpack.c.bf16 %v827_v25, %v826_v62 }
 0x596   :  { %1132 = vmatmul.mubr.bf16.vlgmr.msra.gmra.mrb[20].mxu1 %v828_v52 }
 0x669   :  { %v863_v14 = vpop.f32.mrb[20].mxu1 }
 0x66a   :  { %v864_v2 = vadd.f32 %v1506_v28, %v863_v14  ;;  %v1133_v56 = vpop.f32.mrb[21].mxu1 }
 0x66b   :  { %v866_v24 = vpop.f32.mrb[22].mxu1 }
 0x66c   :  { %v872_v27 = vmul.f32 0.044715, %v864_v2  ;;  %v867_v32 = vadd.f32 %v1506_v28, %v866_v24  ;;  %v1134_v29 = vpop.f32.mrb[23].mxu1  ;;  %v870_v44 = vmul.f32 0.5, %v864_v2 }
 0x66e   :  { %v874_v8 = vmul.f32 %v872_v27, %v864_v2  ;;  %v873_v7 = vmul.f32 0.044715, %v867_v32  ;;  %v871_v45 = vmul.f32 0.5, %v867_v32 }
 0x670   :  { %v876_v33 = vmul.f32 %v874_v8, %v864_v2  ;;  %v875_v34 = vmul.f32 %v873_v7, %v867_v32 }
 0x672   :  { %v878_v35 = vadd.f32 %v876_v33, %v864_v2  ;;  %v877_v36 = vmul.f32 %v875_v34, %v867_v32 }
 0x674   :  { %v880_v39 = vmul.f32 0.7978846, %v878_v35  ;;  %v879_v13 = vadd.f32 %v877_v36, %v867_v32 }
 0x676   :  { %1203 = vtanh.f32 %v880_v39  ;;  %v881_v40 = vmul.f32 0.7978846, %v879_v13 }
 0x678   :  { %1205 = vtanh.f32 %v881_v40 }
 0x680   :  { %v1204_v41 = vpop.eup %1203 }
 0x681   :  { %v884_v42 = vadd.f32 1.0, %v1204_v41 }
 0x682   :  { %v1206_v43 = vpop.eup %1205 }
 0x683   :  { %v885_v47 = vadd.f32 1.0, %v1206_v43  ;;  %v886_v48 = vmul.f32 %v884_v42, %v870_v44 }
 0x685   :  { %v887_v28 = vmul.f32 %v885_v47, %v871_v45 }
 0x687   :  { %v888_v49 = vpack.c.bf16 %v887_v28, %v886_v48 }
 0x689   :  { %1140 = vmatmul.mubr.msk.bf16.vlgmr.msra.gmra.mrb[20].mxu0 %vm305_vm3, %v888_v49 }
 0x75c   :  { %v926_v37 = vpop.f32.mrb[20].mxu0 }
 0x75d   :  { %v933_v50 = vadd.f32 %v926_v37, %v826_v62  ;;  %v1141_v51 = vpop.f32.mrb[21].mxu0 }
 0x75e   :  { %v929_v21 = vpop.f32.mrb[22].mxu0 }
 0x75f   :  { %v935_v31 = vadd.f32 %v1516_v54, %v933_v50  ;;  %v934_v53 = vadd.f32 %v929_v21, %v827_v25  ;;  %v1142_v16 = vpop.f32.mrb[23].mxu0 }
 0x761   :  { %937 = vst [vmem:[#allocation2] sm:$0xff] %v935_v31  ;;  %v936_v55 = vadd.f32 %v1516_v54, %v934_v53 }
 0x763   :  { %938 = vst [vmem:[#allocation2 + $0x8] sm:$0xff] %v936_v55 }
 0x764   :  { %1218 = shalt.err (!%p1215_p4)
}
 0x765   :  { %s1219_s4 = scalar_lea.hbm %s1651_s9, 256 }
 0x766   :  { %p1220_p5 = scmp.ne.s32.totalorder %s1651_s9, %s1219_s4  ;;  %p1223_p6 = scmp.lt.u32.totalorder %s1219_s4, %s1651_s9 }
 0x768   :  { %p1225_p7 = pnand %p1223_p6, %p1220_p5 }
 0x76a   :  { %1228 = shalt.err (!%p1225_p7)
}
 0x76b   :  { %s1235_s28 = smov 128   ;;  %s1236_s29 = smov 8  }
 0x76c   :  { %950 = dma.vmem_to_hbm [thread:$0]  %s945_s22, 256, %s1651_s9, [#allocation3], %s1235_s28, %s1235_s28, %s1236_s29  }
 0x76d   :  { %1229 = dma.done.wait [#allocation3], 256  }
 0x76e   :  { %1230 = vsyncadd [#allocation3], 4294967040 }
 0x76f   :  { %954 = vsyncpa [#allocation3], 1 }

</bundles_post_ra>
